<compile_context>
chip_gen: v7x
topology: tpu7x:2x2x1
jax: 0.10.0
libtpu: 0.0.40
codegen_flags: <defaults>
</compile_context>

<pallas_src>
import functools

import jax
import jax.numpy as jnp
from jax.experimental import pallas as pl
from jax.experimental.pallas import tpu as pltpu


def _cdiv(a, b):
    return -(-a // b)


def _attention_kernel(x_ref, w1_ref, b1_ref, w2_ref, ctx_ref, attn_ref, *,
                      seq_len, mxu_ctx):
    # x_ref:    (Bt, Sp, H)   tile of batch elements (Sp = sublane-padded S)
    # w1_ref:   (H, H2p)      first linear weight, pre-transposed, lane-padded
    # b1_ref:   (1, H2p)      first linear bias, lane-padded with zeros (f32)
    # w2_ref:   (1, H2p)      second linear weight as a row, lane-padded (f32)
    # ctx_ref:  (Bt, H)       output context vectors
    # attn_ref: (Bt, Sp)      output attention weights (lane-dense)
    Bt, Sp, H = x_ref.shape
    H2p = w1_ref.shape[1]

    x = x_ref[...]  # (Bt, Sp, H) in the input dtype

    # Linear(H -> H/2) + Tanh for the whole batch tile as ONE MXU matmul.
    # Sp is sublane-aligned by the wrapper, so this reshape is a free view.
    # (Dropout == identity in eval mode.)
    x2d = x.reshape(Bt * Sp, H)
    h1 = jnp.tanh(
        jnp.dot(x2d, w1_ref[...], preferred_element_type=jnp.float32)
        + b1_ref[...]
    )  # (Bt*Sp, H2p) f32

    # Linear(H/2 -> 1): VPU multiply + lane reduction (avoids an N=1 matmul).
    # b2 is omitted: the softmax below is shift-invariant, so the scalar bias
    # cannot change attn or context.
    scores = jnp.sum(h1.reshape(Bt, Sp, H2p) * w2_ref[...], axis=-1)  # (Bt, Sp)

    if Sp != seq_len:
        # Mask padded sequence positions so they get zero attention mass.
        col = jax.lax.broadcasted_iota(jnp.int32, (Bt, Sp), 1)
        scores = jnp.where(col < seq_len, scores, -1e30)

    # Softmax over the sequence axis (lane-dense reductions).
    m = jnp.max(scores, axis=-1, keepdims=True)
    e = jnp.exp(scores - m)
    denom = jnp.sum(e, axis=-1, keepdims=True)
    # Exact divide: pl.reciprocal(approx=True) would not meet 1e-5 tolerance.
    attn = e / denom  # (Bt, Sp) f32

    attn_ref[...] = attn.astype(attn_ref.dtype)

    if mxu_ctx:
        # context[b] = attn[b] @ x[b]: batched (1,Sp)x(Sp,H) MXU contraction
        # with f32 accumulation — avoids materializing a (Bt,Sp,H) f32 product.
        ctx = jnp.einsum(
            "bqs,bsh->bqh",
            attn[:, None, :].astype(x.dtype), x,
            preferred_element_type=jnp.float32,
        )[:, 0, :]  # (Bt, H) f32
    else:
        # Conservative VPU reduce (fallback path; temporary accounted in sizing).
        ctx = jnp.sum(attn[:, :, None] * x.astype(jnp.float32), axis=1)

    ctx_ref[...] = ctx.astype(ctx_ref.dtype)


def _const_spec(shape, single_buffer):
    """BlockSpec for a grid-invariant operand; single-buffered when supported."""
    index_map = lambda i: (0,) * len(shape)
    if single_buffer:
        try:
            return pl.BlockSpec(shape, index_map, pipeline_mode=pl.Buffered(1))
        except TypeError:
            pass  # older BlockSpec without pipeline_mode — fall through
    return pl.BlockSpec(shape, index_map)


def _plan_tiles(B, Sp, H, H2p, x_itemsize, w_itemsize, sub, optimized):
    """Pick batch-tile size, padded batch size and vmem_limit_bytes."""
    f32 = 4
    try:
        vmem_cap = int(pltpu.get_tpu_info().vmem_capacity_bytes)
    except Exception:
        vmem_cap = 64 << 20  # conservative: v7x-class (64 MiB per TensorCore)

    if vmem_cap >= (100 << 20):      # v5e / v6e class (128 MiB physical VMEM)
        vmem_limit = 96 << 20
        budget = 56 << 20            # target working set
    else:                            # v7x class (64 MiB per TensorCore)
        vmem_limit = 44 << 20
        budget = 22 << 20

    # Grid-invariant operands (w1 single-buffered via pl.Buffered(1) when
    # optimized; count 2 buffers otherwise), subtracted from the budget.
    w_bufs = 1 if optimized else 2
    fixed = w_bufs * H * H2p * w_itemsize + 4 * H2p * f32 + (256 << 10)

    # Per batch-row working set: x block (double-buffered) + in-kernel copy,
    # h1 + h1*w2 product, softmax rows, double-buffered output blocks, ctx
    # accumulation / relayout copies.  Deliberately conservative.
    per_row = (
        3 * Sp * H * x_itemsize
        + 3 * Sp * H2p * f32
        + 8 * Sp * f32
        + 2 * (H + Sp) * x_itemsize
        + 8 * H * f32
    )
    if not optimized:
        # VPU fallback materializes the full (Bt, Sp, H) f32 product (+ upcast).
        per_row += 2 * Sp * H * f32

    avail = budget - fixed
    bt_vmem = max(1, avail // per_row)

    # Keep >= 2 grid blocks whenever the batch allows it, so both v7x
    # TensorCores (and megacore elsewhere) get work.  Tiny batches stay in a
    # single block (block dims == array dims, no padding needed).
    if B >= 2 * sub:
        bt_cap = max(sub, (_cdiv(B, 2) // sub) * sub)
    else:
        bt_cap = B

    bt = min(bt_vmem, bt_cap)
    if bt >= B:
        bt, b_pad = B, B
    else:
        bt = max(sub, (bt // sub) * sub)       # output blocks need sublane alignment
        nb = _cdiv(B, bt)
        bt = _cdiv(_cdiv(B, nb), sub) * sub    # rebalance blocks, minimize padding
        b_pad = nb * bt

    # If sublane alignment forced bt above the budget-derived value, raise the
    # scoped-VMEM limit to what the chosen tile actually needs (bounded by
    # physical VMEM minus a reserve).
    need = fixed + bt * per_row
    vmem_limit = max(vmem_limit, int(need * 1.25))
    vmem_limit = min(vmem_limit, vmem_cap - (8 << 20))
    vmem_limit = max(vmem_limit, 32 << 20)
    return bt, b_pad, int(vmem_limit)


def _run(xp, w1p, b1p, w2p, *, bt, b_pad, Sp, H, vmem_limit, dtype, seq_len,
         optimized):
    H2p = w1p.shape[1]
    grid = (b_pad // bt,)
    kernel = functools.partial(_attention_kernel, seq_len=seq_len,
                               mxu_ctx=optimized)
    return pl.pallas_call(
        kernel,
        out_shape=(
            jax.ShapeDtypeStruct((b_pad, H), dtype),
            jax.ShapeDtypeStruct((b_pad, Sp), dtype),
        ),
        grid_spec=pltpu.PrefetchScalarGridSpec(
            num_scalar_prefetch=0,
            grid=grid,
            in_specs=[
                pl.BlockSpec((bt, Sp, H), lambda i: (i, 0, 0)),
                _const_spec((H, H2p), optimized),
                _const_spec((1, H2p), optimized),
                _const_spec((1, H2p), optimized),
            ],
            out_specs=[
                pl.BlockSpec((bt, H), lambda i: (i, 0)),
                pl.BlockSpec((bt, Sp), lambda i: (i, 0)),
            ],
        ),
        compiler_params=pltpu.CompilerParams(
            dimension_semantics=("parallel",),
            vmem_limit_bytes=vmem_limit,
        ),
    )(xp, w1p, b1p, w2p)


def lstm_attention(x, w1, b1, w2, b2):
    """Forward of LSTMAttention (eval mode).

    x:  (B, S, H)
    w1: (H, H2)  first Linear weight, stored [in, out]
    b1: (H2,)
    w2: (H2, 1)  second Linear weight, stored [in, out]
    b2: (1,)     unused: softmax over dim=1 is shift-invariant.
    Returns (context (B, H), attn (B, S, 1)).
    """
    del b2  # shift-invariant under the sequence softmax; cannot affect outputs
    B, S, H = x.shape
    H2 = w1.shape[1]
    dtype = x.dtype
    itemsize = jnp.dtype(dtype).itemsize
    sub = {4: 8, 2: 16, 1: 32}.get(itemsize, 8)   # sublane tile for this dtype

    # Pad S to a sublane multiple (free reshapes) and H2 to a lane multiple
    # (exact: tanh-of-padded columns is multiplied by zero-padded w2).
    Sp = _cdiv(S, sub) * sub
    H2p = max(128, _cdiv(H2, 128) * 128)

    # Keep the MXU operand in bf16 when the activations are bf16; biases and
    # the VPU-side w2 row stay f32.
    wdtype = jnp.bfloat16 if dtype == jnp.bfloat16 else jnp.float32
    w1p = jnp.zeros((H, H2p), wdtype).at[:, :H2].set(w1.astype(wdtype))
    b1p = jnp.zeros((1, H2p), jnp.float32).at[0, :H2].set(b1.astype(jnp.float32))
    w2p = jnp.zeros((1, H2p), jnp.float32).at[0, :H2].set(
        w2.reshape(-1).astype(jnp.float32))

    def attempt(optimized):
        bt, b_pad, vmem_limit = _plan_tiles(
            B, Sp, H, H2p, itemsize, jnp.dtype(wdtype).itemsize, sub, optimized)
        xp = x
        if b_pad != B or Sp != S:
            xp = jnp.pad(x, ((0, b_pad - B), (0, Sp - S), (0, 0)))
        return _run(xp, w1p, b1p, w2p, bt=bt, b_pad=b_pad, Sp=Sp, H=H,
                    vmem_limit=vmem_limit, dtype=dtype, seq_len=S,
                    optimized=optimized)

    try:
        ctx, attn = attempt(True)
    except Exception:
        # Conservative build: double-buffered weights + VPU context reduce
        # (previously proven lowering path), with its temporary accounted for.
        ctx, attn = attempt(False)

    ctx = ctx[:B]
    attn = attn[:B, :S].reshape(B, S, 1)
    return ctx, attn


def _reference(x, w1, b1, w2, b2):
    hp = jax.lax.Precision.HIGHEST
    h1 = jnp.tanh(jnp.einsum("bsh,hk->bsk", x, w1, precision=hp) + b1)
    scores = jnp.einsum("bsk,ko->bso", h1, w2, precision=hp) + b2  # (B, S, 1)
    attn = jax.nn.softmax(scores, axis=1)
    ctx = jnp.einsum("bso,bsh->boh", attn, x, precision=hp)[:, 0, :]  # (B, H)
    return ctx, attn


if __name__ == "__main__":
    B, S, H = 2, 8, 32
    H2 = H // 2

    key = jax.random.PRNGKey(0)
    kx, k1, kb1, k2, kb2 = jax.random.split(key, 5)

    x = jax.random.normal(kx, (B, S, H), dtype=jnp.float32)
    # Deterministic parameter init (roughly PyTorch Linear uniform scale).
    w1 = (jax.random.uniform(k1, (H, H2), minval=-1.0, maxval=1.0) / jnp.sqrt(H)).astype(jnp.float32)
    b1 = (jax.random.uniform(kb1, (H2,), minval=-1.0, maxval=1.0) / jnp.sqrt(H)).astype(jnp.float32)
    w2 = (jax.random.uniform(k2, (H2, 1), minval=-1.0, maxval=1.0) / jnp.sqrt(H2)).astype(jnp.float32)
    b2 = (jax.random.uniform(kb2, (1,), minval=-1.0, maxval=1.0) / jnp.sqrt(H2)).astype(jnp.float32)

    ctx, attn = lstm_attention(x, w1, b1, w2, b2)
    jax.block_until_ready((ctx, attn))

    ctx_ref, attn_ref = _reference(x, w1, b1, w2, b2)
    assert ctx.shape == (B, H) and attn.shape == (B, S, 1)
    assert jnp.allclose(ctx, ctx_ref, atol=1e-5, rtol=1e-5)
    assert jnp.allclose(attn, attn_ref, atol=1e-5, rtol=1e-5)

    print("KERNEL_OK")
</pallas_src>

<mosaic_0001>
module attributes {stable_mosaic.version = 11 : i64} {
  func.func @_attention_kernel(%arg0: i32, %arg1: memref<2x8x32xf32, #tpu.memory_space<vmem>>, %arg2: memref<32x128xf32, #tpu.memory_space<vmem>>, %arg3: memref<1x128xf32, #tpu.memory_space<vmem>>, %arg4: memref<1x128xf32, #tpu.memory_space<vmem>>, %arg5: memref<2x32xf32, #tpu.memory_space<vmem>>, %arg6: memref<2x8xf32, #tpu.memory_space<vmem>>) attributes {dimension_semantics = [#tpu.dimension_semantics<parallel>], iteration_bounds = array<i64: 1>, scalar_prefetch = 0 : i64, scratch_operands = 0 : i64, tpu.core_type = #tpu.core_type<tc>, window_params = [{transform_indices = @transform_0, window_bounds = array<i64: 2, 8, 32>}, {pipeline_mode = #tpu.pipeline_mode<synchronous>, transform_indices = @transform_1, window_bounds = array<i64: 32, 128>}, {pipeline_mode = #tpu.pipeline_mode<synchronous>, transform_indices = @transform_2, window_bounds = array<i64: 1, 128>}, {pipeline_mode = #tpu.pipeline_mode<synchronous>, transform_indices = @transform_3, window_bounds = array<i64: 1, 128>}, {transform_indices = @transform_4, window_bounds = array<i64: 2, 32>}, {transform_indices = @transform_5, window_bounds = array<i64: 2, 8>}]} {
    %c0 = arith.constant 0 : index
    %c0_0 = arith.constant 0 : index
    %c0_1 = arith.constant 0 : index
    %0 = vector.load %arg1[%c0, %c0_0, %c0_1] : memref<2x8x32xf32, #tpu.memory_space<vmem>>, vector<2x8x32xf32>
    %1 = vector.shape_cast %0 : vector<2x8x32xf32> to vector<16x32xf32>
    %c0_2 = arith.constant 0 : index
    %c0_3 = arith.constant 0 : index
    %2 = vector.load %arg2[%c0_2, %c0_3] : memref<32x128xf32, #tpu.memory_space<vmem>>, vector<32x128xf32>
    %cst = arith.constant dense<0.000000e+00> : vector<16x128xf32>
    %3 = tpu.matmul %1, %2, %cst {dimension_numbers = #tpu.dot_dimension_numbers<[1], [0], [0], [1], [0, 0, 1, 1], [], []>} : vector<16x32xf32>, vector<32x128xf32>, vector<16x128xf32> -> vector<16x128xf32>
    %c0_4 = arith.constant 0 : index
    %c0_5 = arith.constant 0 : index
    %4 = vector.load %arg3[%c0_4, %c0_5] : memref<1x128xf32, #tpu.memory_space<vmem>>, vector<1x128xf32>
    %5 = vector.broadcast %4 : vector<1x128xf32> to vector<16x128xf32>
    %6 = arith.addf %3, %5 : vector<16x128xf32>
    %7 = math.tanh %6 : vector<16x128xf32>
    %8 = vector.shape_cast %7 : vector<16x128xf32> to vector<2x8x128xf32>
    %c0_6 = arith.constant 0 : index
    %c0_7 = arith.constant 0 : index
    %9 = vector.load %arg4[%c0_6, %c0_7] : memref<1x128xf32, #tpu.memory_space<vmem>>, vector<1x128xf32>
    %10 = vector.shape_cast %9 : vector<1x128xf32> to vector<1x1x128xf32>
    %11 = vector.broadcast %10 : vector<1x1x128xf32> to vector<2x8x128xf32>
    %12 = arith.mulf %8, %11 : vector<2x8x128xf32>
    %cst_8 = arith.constant dense<0.000000e+00> : vector<2x8xf32>
    %13 = vector.multi_reduction <add>, %12, %cst_8 [2] : vector<2x8x128xf32> to vector<2x8xf32>
    %cst_9 = arith.constant dense<0xFF800000> : vector<2xf32>
    %14 = vector.multi_reduction <maximumf>, %13, %cst_9 [1] : vector<2x8xf32> to vector<2xf32>
    %15 = vector.shape_cast %14 : vector<2xf32> to vector<2x1xf32>
    %16 = vector.broadcast %15 : vector<2x1xf32> to vector<2x8xf32>
    %17 = arith.subf %13, %16 : vector<2x8xf32>
    %18 = math.exp %17 : vector<2x8xf32>
    %cst_10 = arith.constant dense<0.000000e+00> : vector<2xf32>
    %19 = vector.multi_reduction <add>, %18, %cst_10 [1] : vector<2x8xf32> to vector<2xf32>
    %20 = vector.shape_cast %19 : vector<2xf32> to vector<2x1xf32>
    %21 = vector.broadcast %20 : vector<2x1xf32> to vector<2x8xf32>
    %22 = arith.divf %18, %21 : vector<2x8xf32>
    %c0_11 = arith.constant 0 : index
    %c0_12 = arith.constant 0 : index
    %23 = vector.load %arg6[%c0_11, %c0_12] : memref<2x8xf32, #tpu.memory_space<vmem>>, vector<2x8xf32>
    tpu.vector_store %arg6[%c0_11, %c0_12], %22 {strides = array<i32>} : memref<2x8xf32, #tpu.memory_space<vmem>>, vector<2x8xf32>,
    %24 = vector.shape_cast %22 : vector<2x8xf32> to vector<2x1x8xf32>
    "tpu.trace_start"() <{level = 10 : i32, message = "bqs,bsh->bqh"}> : () -> ()
    %cst_13 = arith.constant dense<0.000000e+00> : vector<2x1x32xf32>
    %25 = tpu.matmul %24, %0, %cst_13 {dimension_numbers = #tpu.dot_dimension_numbers<[2], [1], [1], [2], [0, 0, 0, 1, 1, 2], [0], [0]>} : vector<2x1x8xf32>, vector<2x8x32xf32>, vector<2x1x32xf32> -> vector<2x1x32xf32>
    "tpu.trace_stop"() : () -> ()
    %26 = vector.shape_cast %25 : vector<2x1x32xf32> to vector<2x32xf32>
    %c0_14 = arith.constant 0 : index
    %c0_15 = arith.constant 0 : index
    %27 = vector.load %arg5[%c0_14, %c0_15] : memref<2x32xf32, #tpu.memory_space<vmem>>, vector<2x32xf32>
    tpu.vector_store %arg5[%c0_14, %c0_15], %26 {strides = array<i32>} : memref<2x32xf32, #tpu.memory_space<vmem>>, vector<2x32xf32>,
    return
  }
  func.func @transform_0(%arg0: i32) -> (i32, i32, i32) {
    %c0_i32 = arith.constant 0 : i32
    %c0_i32_0 = arith.constant 0 : i32
    %c0_i32_1 = arith.constant 0 : i32
    return %arg0, %c0_i32, %c0_i32_0 : i32, i32, i32
  }
  func.func @transform_1(%arg0: i32) -> (i32, i32) {
    %c0_i32 = arith.constant 0 : i32
    %c0_i32_0 = arith.constant 0 : i32
    %c0_i32_1 = arith.constant 0 : i32
    return %c0_i32, %c0_i32_0 : i32, i32
  }
  func.func @transform_2(%arg0: i32) -> (i32, i32) {
    %c0_i32 = arith.constant 0 : i32
    %c0_i32_0 = arith.constant 0 : i32
    %c0_i32_1 = arith.constant 0 : i32
    return %c0_i32, %c0_i32_0 : i32, i32
  }
  func.func @transform_3(%arg0: i32) -> (i32, i32) {
    %c0_i32 = arith.constant 0 : i32
    %c0_i32_0 = arith.constant 0 : i32
    %c0_i32_1 = arith.constant 0 : i32
    return %c0_i32, %c0_i32_0 : i32, i32
  }
  func.func @transform_4(%arg0: i32) -> (i32, i32) {
    %c0_i32 = arith.constant 0 : i32
    %c0_i32_0 = arith.constant 0 : i32
    return %arg0, %c0_i32 : i32, i32
  }
  func.func @transform_5(%arg0: i32) -> (i32, i32) {
    %c0_i32 = arith.constant 0 : i32
    %c0_i32_0 = arith.constant 0 : i32
    return %arg0, %c0_i32 : i32, i32
  }
}

module attributes {stable_mosaic.version = 11 : i64} {
  func.func @_attention_kernel(%arg0: i32, %arg1: memref<2x8x32xf32, #tpu.memory_space<vmem>>, %arg2: memref<32x128xf32, #tpu.memory_space<vmem>>, %arg3: memref<1x128xf32, #tpu.memory_space<vmem>>, %arg4: memref<1x128xf32, #tpu.memory_space<vmem>>, %arg5: memref<2x32xf32, #tpu.memory_space<vmem>>, %arg6: memref<2x8xf32, #tpu.memory_space<vmem>>) attributes {dimension_semantics = [#tpu.dimension_semantics<parallel>], iteration_bounds = array<i64: 1>, scalar_prefetch = 0 : i64, scratch_operands = 0 : i64, tpu.core_type = #tpu.core_type<tc>, window_params = [{transform_indices = @transform_0, window_bounds = array<i64: 2, 8, 32>}, {pipeline_mode = #tpu.pipeline_mode<synchronous>, transform_indices = @transform_1, window_bounds = array<i64: 32, 128>}, {pipeline_mode = #tpu.pipeline_mode<synchronous>, transform_indices = @transform_2, window_bounds = array<i64: 1, 128>}, {pipeline_mode = #tpu.pipeline_mode<synchronous>, transform_indices = @transform_3, window_bounds = array<i64: 1, 128>}, {transform_indices = @transform_4, window_bounds = array<i64: 2, 32>}, {transform_indices = @transform_5, window_bounds = array<i64: 2, 8>}]} {
    %c0 = arith.constant 0 : index
    %c0_0 = arith.constant 0 : index
    %c0_1 = arith.constant 0 : index
    %0 = vector.load %arg1[%c0, %c0_0, %c0_1] : memref<2x8x32xf32, #tpu.memory_space<vmem>>, vector<2x8x32xf32>
    %1 = vector.shape_cast %0 : vector<2x8x32xf32> to vector<16x32xf32>
    %c0_2 = arith.constant 0 : index
    %c0_3 = arith.constant 0 : index
    %2 = vector.load %arg2[%c0_2, %c0_3] : memref<32x128xf32, #tpu.memory_space<vmem>>, vector<32x128xf32>
    %cst = arith.constant dense<0.000000e+00> : vector<16x128xf32>
    %3 = tpu.matmul %1, %2, %cst {dimension_numbers = #tpu.dot_dimension_numbers<[1], [0], [0], [1], [0, 0, 1, 1], [], []>} : vector<16x32xf32>, vector<32x128xf32>, vector<16x128xf32> -> vector<16x128xf32>
    %c0_4 = arith.constant 0 : index
    %c0_5 = arith.constant 0 : index
    %4 = vector.load %arg3[%c0_4, %c0_5] : memref<1x128xf32, #tpu.memory_space<vmem>>, vector<1x128xf32>
    %5 = vector.broadcast %4 : vector<1x128xf32> to vector<16x128xf32>
    %6 = arith.addf %3, %5 : vector<16x128xf32>
    %7 = math.tanh %6 : vector<16x128xf32>
    %8 = vector.shape_cast %7 : vector<16x128xf32> to vector<2x8x128xf32>
    %c0_6 = arith.constant 0 : index
    %c0_7 = arith.constant 0 : index
    %9 = vector.load %arg4[%c0_6, %c0_7] : memref<1x128xf32, #tpu.memory_space<vmem>>, vector<1x128xf32>
    %10 = vector.shape_cast %9 : vector<1x128xf32> to vector<1x1x128xf32>
    %11 = vector.broadcast %10 : vector<1x1x128xf32> to vector<2x8x128xf32>
    %12 = arith.mulf %8, %11 : vector<2x8x128xf32>
    %cst_8 = arith.constant dense<0.000000e+00> : vector<2x8xf32>
    %13 = vector.multi_reduction <add>, %12, %cst_8 [2] : vector<2x8x128xf32> to vector<2x8xf32>
    %cst_9 = arith.constant dense<0xFF800000> : vector<2xf32>
    %14 = vector.multi_reduction <maximumf>, %13, %cst_9 [1] : vector<2x8xf32> to vector<2xf32>
    %15 = vector.shape_cast %14 : vector<2xf32> to vector<2x1xf32>
    %16 = vector.broadcast %15 : vector<2x1xf32> to vector<2x8xf32>
    %17 = arith.subf %13, %16 : vector<2x8xf32>
    %18 = math.exp %17 : vector<2x8xf32>
    %cst_10 = arith.constant dense<0.000000e+00> : vector<2xf32>
    %19 = vector.multi_reduction <add>, %18, %cst_10 [1] : vector<2x8xf32> to vector<2xf32>
    %20 = vector.shape_cast %19 : vector<2xf32> to vector<2x1xf32>
    %21 = vector.broadcast %20 : vector<2x1xf32> to vector<2x8xf32>
    %22 = arith.divf %18, %21 : vector<2x8xf32>
    %c0_11 = arith.constant 0 : index
    %c0_12 = arith.constant 0 : index
    %23 = vector.load %arg6[%c0_11, %c0_12] : memref<2x8xf32, #tpu.memory_space<vmem>>, vector<2x8xf32>
    tpu.vector_store %arg6[%c0_11, %c0_12], %22 {strides = array<i32>} : memref<2x8xf32, #tpu.memory_space<vmem>>, vector<2x8xf32>,
    %24 = vector.shape_cast %22 : vector<2x8xf32> to vector<2x8x1xf32>
    %25 = vector.broadcast %24 : vector<2x8x1xf32> to vector<2x8x32xf32>
    %26 = arith.mulf %25, %0 : vector<2x8x32xf32>
    %cst_13 = arith.constant dense<0.000000e+00> : vector<2x32xf32>
    %27 = vector.multi_reduction <add>, %26, %cst_13 [1] : vector<2x8x32xf32> to vector<2x32xf32>
    %c0_14 = arith.constant 0 : index
    %c0_15 = arith.constant 0 : index
    %28 = vector.load %arg5[%c0_14, %c0_15] : memref<2x32xf32, #tpu.memory_space<vmem>>, vector<2x32xf32>
    tpu.vector_store %arg5[%c0_14, %c0_15], %27 {strides = array<i32>} : memref<2x32xf32, #tpu.memory_space<vmem>>, vector<2x32xf32>,
    return
  }
  func.func @transform_0(%arg0: i32) -> (i32, i32, i32) {
    %c0_i32 = arith.constant 0 : i32
    %c0_i32_0 = arith.constant 0 : i32
    %c0_i32_1 = arith.constant 0 : i32
    return %arg0, %c0_i32, %c0_i32_0 : i32, i32, i32
  }
  func.func @transform_1(%arg0: i32) -> (i32, i32) {
    %c0_i32 = arith.constant 0 : i32
    %c0_i32_0 = arith.constant 0 : i32
    %c0_i32_1 = arith.constant 0 : i32
    return %c0_i32, %c0_i32_0 : i32, i32
  }
  func.func @transform_2(%arg0: i32) -> (i32, i32) {
    %c0_i32 = arith.constant 0 : i32
    %c0_i32_0 = arith.constant 0 : i32
    %c0_i32_1 = arith.constant 0 : i32
    return %c0_i32, %c0_i32_0 : i32, i32
  }
  func.func @transform_3(%arg0: i32) -> (i32, i32) {
    %c0_i32 = arith.constant 0 : i32
    %c0_i32_0 = arith.constant 0 : i32
    %c0_i32_1 = arith.constant 0 : i32
    return %c0_i32, %c0_i32_0 : i32, i32
  }
  func.func @transform_4(%arg0: i32) -> (i32, i32) {
    %c0_i32 = arith.constant 0 : i32
    %c0_i32_0 = arith.constant 0 : i32
    return %arg0, %c0_i32 : i32, i32
  }
  func.func @transform_5(%arg0: i32) -> (i32, i32) {
    %c0_i32 = arith.constant 0 : i32
    %c0_i32_0 = arith.constant 0 : i32
    return %arg0, %c0_i32 : i32, i32
  }
}

</mosaic_0001>

<bundles_post_ra>
// kernel: tpu_custom_call.1
= control target key start
LH: loop header
LB: loop body
LE: loop exit
PB: predicated region body
PF: predicated region fallthrough
CT: control target
= control target key end

     0   :  { %11 = vsyncpa [#allocation3], 0  ;;  %s700_s0 = inlined_call_operand.hbm [shape: f32[2,8,32], index: 0, kind: input, shape index: {}]   ;;  %s701_s1 = inlined_call_operand.hbm [shape: f32[32,128], index: 1, kind: input, shape index: {}]   ;;  %s702_s2 = inlined_call_operand.vmem [shape: f32[1,128], index: 2, kind: input, shape index: {}]   ;;  %s703_s3 = inlined_call_operand.vmem [shape: f32[1,128], index: 3, kind: input, shape index: {}]   ;;  %s704_s4 = inlined_call_operand.hbm [shape: f32[2,32], index: 4, kind: output, shape index: {0}]   ;;  %s705_s5 = inlined_call_operand.hbm [shape: f32[2,8], index: 5, kind: output, shape index: {1}]  }
   0x1   :  { %12 = vsyncpa [#allocation6], 0 }
   0x2   :  { %13 = vsyncpa [#allocation4], 0 }
   0x3   :  { %14 = vsyncpa [#allocation9], 0  ;;  %s596_s18 = smov [#allocation2]   ;;  %s500_s22 = scalar_lea.hbm %s700_s0, 256 }
   0x4   :  { %s20_s19 = sshll.u32 %s596_s18, 4  ;;  %p501_p0 = scmp.ne.s32.totalorder %s700_s0, %s500_s22  ;;  %s21_s19 = int_to_ptr.vmem [resolvable:$true] %s20_s19 }
   0x5   :  { %p504_p1 = scmp.lt.u32.totalorder %s500_s22, %s700_s0 }
   0x7   :  { %p506_p2 = pnand %p504_p1, %p501_p0 }
   0x9   :  { %509 = shalt.err (!%p506_p2)
}
   0xa   :  { %s510_s27 = scalar_lea.vmem %s21_s19, 256  ;;  %p515_p4 = scmp.lt.s32.totalorder %s21_s19, %s21_s19 }
   0xb   :  { %p511_p3 = scmp.ne.s32.totalorder %s21_s19, %s510_s27  ;;  %p516_p5 = scmp.lt.s32.totalorder %s510_s27, %s510_s27 }
   0xd   :  { %p517_p6 = por %p516_p5, %p515_p4 }
   0xf   :  { %p518_p7 = pnand %p517_p6, %p511_p3 }
  0x11   :  { %521 = shalt.err (!%p518_p7)
}
  0x12   :  { %s597_s28 = smov 128   ;;  %s598_s29 = smov 8  }
  0x13   :  { %26 = dma.hbm_to_vmem [thread:$0]  %s700_s0, 256, %s21_s19, [#allocation3], %s597_s28, %s597_s28, %s598_s29  }
  0x14   :  { %s599_s7 = smov [#allocation5]   ;;  %s522_s11 = scalar_lea.hbm %s701_s1, 512 }
  0x15   :  { %s32_s8 = sshll.u32 %s599_s7, 4  ;;  %p523_p8 = scmp.ne.s32.totalorder %s701_s1, %s522_s11  ;;  %s33_s8 = int_to_ptr.vmem [resolvable:$true] %s32_s8 }
  0x16   :  { %p526_p9 = scmp.lt.u32.totalorder %s522_s11, %s701_s1 }
  0x18   :  { %p528_p10 = pnand %p526_p9, %p523_p8 }
  0x1a   :  { %531 = shalt.err (!%p528_p10)
}
  0x1b   :  { %s532_s16 = scalar_lea.vmem %s33_s8, 512  ;;  %p537_p12 = scmp.lt.s32.totalorder %s33_s8, %s33_s8 }
  0x1c   :  { %p533_p11 = scmp.ne.s32.totalorder %s33_s8, %s532_s16  ;;  %p538_p13 = scmp.lt.s32.totalorder %s532_s16, %s532_s16 }
  0x1e   :  { %p539_p0 = por %p538_p13, %p537_p12 }
  0x20   :  { %p540_p1 = pnand %p539_p0, %p533_p11 }
  0x22   :  { %543 = shalt.err (!%p540_p1)
}
  0x23   :  { %38 = dma.hbm_to_vmem [thread:$0]  %s701_s1, 512, %s33_s8, [#allocation6], %s597_s28, %s597_s28, %s598_s29  }
  0x24   :  { %588 = dma.done.wait [#allocation3], 256  }
  0x25   :  { %589 = vsyncadd [#allocation3], 4294967040 }
  0x26   :  { %590 = dma.done.wait [#allocation6], 512  }
  0x27   :  { %591 = vsyncadd [#allocation6], 4294966784  ;;  %vm62_vm0 = vcmask 261120   ;;  %v51_v0 = vld [vmem:[#allocation5] sm:$0xff]  ;;  %v52_v1 = vld [vmem:[#allocation5 + $0x8] sm:$0xff]  ;;  %v161_v18 = vlaneseq  ;;  %vm171_vm1 = vcmask 1041409  }
  0x28   :  { %v53_v2 = vld [vmem:[#allocation5 + $0x10] sm:$0xff]  ;;  %v469_v3 = vpack.c.bf16 %v52_v1, %v51_v0  ;;  %v54_v4 = vld [vmem:[#allocation5 + $0x18] sm:$0xff]  ;;  %vm174_vm2 = vcmask 58368   ;;  %v600_v28 = vmov 0   ;;  %v601_v46 = vmov 0.0  }
  0x29   :  { %v49_v5 = vld [vmem:[#allocation2] sm:$0xff]  ;;  %v473_v6 = vpack.c.bf16 %v54_v4, %v53_v2  ;;  %v659_v7 = vld [vmem:[#allocation2 + $0x8] sm:$0xff]  ;;  %v162_v19 = vand.u32 127, %v161_v18  ;;  %v164_v20 = vshrl.u32 %v161_v18, 7  ;;  %487 = vset.pattern.permute.xlu0 %v600_v28  ;;  %486 = vset.pattern.permute.xlu1 %v600_v28  ;;  %vm602_vm3 = vmmov 0  }
  0x2a   :  { %456 = vmatprep.mubr.msk.f32.mxu0 %vm62_vm0, %v49_v5  ;;  %470 = vmatprep.subr.bf16.mxu0 %v469_v3  ;;  %v432_v8 = vld [vmem:[%s702_s2] ss:$0 sm:$0xff]  ;;  %vm250_vm4 = vcmask 64512   ;;  %s603_s2 = smov [#allocation8]  }
  0x2b   :  { %472 = vmatpush3.bf16.msra.mxu0 %v469_v3  ;;  %v435_v13 = vld [vmem:[%s703_s3] ss:$0 sm:$0xff]  ;;  %v165_v22 = vsub.s32 %v162_v19, %v164_v20  ;;  %v181_v29 = vsub.s32 0, %v164_v20  ;;  %v185_v30 = vsub.s32 1, %v164_v20  ;;  %459 = vmatprep.subr.mxu1 %v601_v46  ;;  %s418_s3 = sshll.u32 %s603_s2, 4  ;;  %s419_s3 = int_to_ptr.vmem [resolvable:$true] %s418_s3 }
  0x2c   :  { %474 = vmatprep.subr.bf16.mxu0 %v473_v6  ;;  %460 = vmatpush3.msra.mxu1 %v49_v5  ;;  %s544_s21 = scalar_lea.vmem %s419_s3, 32  ;;  %p549_p3 = scmp.lt.s32.totalorder %s419_s3, %s419_s3 }
  0x2d   :  { %464 = vmatprep.subr.mxu1 %v601_v46  ;;  %461 = vmatprep.mubr.msk.f32.mxu1 %vm602_vm3, %v601_v46  ;;  %p545_p2 = scmp.ne.s32.totalorder %s419_s3, %s544_s21  ;;  %p550_p4 = scmp.lt.s32.totalorder %s544_s21, %s544_s21 }
  0x2f   :  { %476 = vmatpush3.bf16.msra.mxu0 %v473_v6  ;;  %p551_p5 = por %p550_p4, %p549_p3 }
  0x31   :  { %p552_p6 = pnand %p551_p5, %p545_p2 }
  0x32   :  { %457 = vmatmul.mubr.msk.f32.vlgmr.msra.gmra.mrb[0].mxu0 %vm62_vm0, %v659_v7 }
 0x105   :  { %v458_v9 = vpop.f32.mrb[0].mxu0 }
 0x106   :  { %v135_v10 = vpop.f32.mrb[1].mxu0  ;;  %v141_v11 = vadd.f32 %v458_v9, %v432_v8 }
 0x107   :  { %v136_v12 = vadd.f32 %v432_v8, %v135_v10 }
 0x109   :  { %488 = vtanh.f32 %v136_v12 }
 0x10a   :  { %490 = vtanh.f32 %v141_v11 }
 0x113   :  { %v489_v14 = vpop.eup %488 }
 0x114   :  { %v153_v15 = vmul.f32 %v489_v14, %v435_v13  ;;  %v491_v16 = vpop.eup %490 }
 0x115   :  { %v154_v17 = vmul.f32 %v491_v16, %v435_v13 }
 0x116   :  { %155 = vadd.xlane.f32.xlu0 %v153_v15 }
 0x11a   :  { %157 = vadd.xlane.f32.xlu0 %v154_v17 }
 0x1a3   :  { %v156_v21 = vpop.xlane.xlu0 %155 }
 0x1a4   :  { %v166_v24 = vrot.slane %v156_v21, %v165_v22 }
 0x1a7   :  { %v158_v23 = vpop.xlane.xlu0 %157 }
 0x1a8   :  { %v170_v25 = vrot.slane %v158_v23, %v165_v22 }
 0x1aa   :  { %v172_v26 = vsel %vm171_vm1, %v170_v25, %v166_v24 }
 0x1ab   :  { %v175_v27 = vsel %vm174_vm2, %v172_v26, -inf }
 0x1ac   :  { %176 = vmax.xlane.f32.xlu1 %v175_v27 }
 0x239   :  { %v177_v31 = vpop.xlane.xlu1 %176 }
 0x23a   :  { %v182_v32 = vrot.slane %v177_v31, %v181_v29  ;;  %v186_v33 = vrot.slane %v177_v31, %v185_v30 }
 0x23c   :  { %v189_v34 = vsub.f32 %v156_v21, %v182_v32  ;;  %v190_v35 = vsub.f32 %v158_v23, %v186_v33 }
 0x23e   :  { %v191_v36 = vmul.f32 1.442695, %v189_v34  ;;  %v193_v37 = vmul.f32 1.442695, %v190_v35 }
 0x240   :  { %492 = vpow2.f32 %v191_v36 }
 0x241   :  { %494 = vpow2.f32 %v193_v37 }
 0x24a   :  { %v493_v38 = vpop.eup %492 }
 0x24b   :  { %v495_v39 = vpop.eup %494  ;;  %198 = vperm.xlu1 %486, %v493_v38  }
 0x24c   :  { %201 = vperm.xlu0 %487, %v495_v39  }
 0x2ca   :  { %v199_v40 = vpop.permute.xlu1 %198 }
 0x2cb   :  { %v202_v41 = vpop.permute.xlu0 %201  ;;  %v206_v42 = vrot.slane %v199_v40, %v165_v22 }
 0x2cc   :  { %v210_v43 = vrot.slane %v202_v41, %v165_v22 }
 0x2ce   :  { %v211_v44 = vsel %vm171_vm1, %v210_v43, %v206_v42 }
 0x2cf   :  { %v213_v45 = vsel %vm174_vm2, %v211_v44, 0.0 }
 0x2d0   :  { %214 = vadd.xlane.f32.xlu1 %v213_v45 }
 0x35d   :  { %v215_v47 = vpop.xlane.xlu1 %214 }
 0x35e   :  { %v220_v48 = vrot.slane %v215_v47, %v181_v29  ;;  %v224_v49 = vrot.slane %v215_v47, %v185_v30 }
 0x360   :  { %496 = vrcp.f32 %v220_v48 }
 0x361   :  { %498 = vrcp.f32 %v224_v49 }
 0x36a   :  { %v497_v50 = vpop.eup %496 }
 0x36b   :  { %v228_v51 = vmul.f32 %v497_v50, %v493_v38  ;;  %v499_v52 = vpop.eup %498 }
 0x36c   :  { %v230_v53 = vmul.f32 %v499_v52, %v495_v39 }
 0x36d   :  { %234 = vperm.xlu0 %487, %v228_v51  }
 0x371   :  { %237 = vperm.xlu0 %487, %v230_v53  }
 0x3ec   :  { %v235_v54 = vpop.permute.xlu0 %234 }
 0x3ed   :  { %v242_v55 = vrot.slane %v235_v54, %v165_v22 }
 0x3ef   :  { %462 = vmatmul.mubr.msk.f32.vlgmr.msra.gmra.mrb[0].mxu1 %vm250_vm4, %v242_v55 }
 0x3f0   :  { %465 = vmatpush3.msra.mxu1 %v659_v7  ;;  %v238_v56 = vpop.permute.xlu0 %237  ;;  %466 = vmatprep.mubr.msk.f32.mxu1 %vm602_vm3, %v601_v46 }
 0x3f1   :  { %v246_v57 = vrot.slane %v238_v56, %v165_v22 }
 0x3f3   :  { %467 = vmatmul.mubr.msk.f32.vlgmr.msra.gmra.mrb[2].mxu1 %vm250_vm4, %v246_v57  ;;  %v247_v58 = vsel %vm171_vm1, %v246_v57, %v242_v55 }
 0x3f4   :  { %249 = vst.msk [vmem:[#allocation8] sm:$0x3] %vm174_vm2, %v247_v58 }
 0x3f5   :  { %555 = shalt.err (!%p552_p6)
}
 0x3f6   :  { %s556_s24 = scalar_lea.hbm %s705_s5, 32 }
 0x3f7   :  { %p557_p7 = scmp.ne.s32.totalorder %s705_s5, %s556_s24  ;;  %p560_p8 = scmp.lt.u32.totalorder %s556_s24, %s705_s5 }
 0x3f9   :  { %p562_p9 = pnand %p560_p8, %p557_p7 }
 0x3fb   :  { %565 = shalt.err (!%p562_p9)
}
 0x3fc   :  { %421 = dma.vmem_to_hbm [thread:$0]  %s419_s3, 32, %s705_s5, [#allocation9]   ;;  %vm400_vm5 = vcmask 254976  }
 0x3fd   :  { %s604_s6 = smov [#allocation7]  }
 0x3fe   :  { %s408_s7 = sshll.u32 %s604_s6, 4  ;;  %s409_s7 = int_to_ptr.vmem [resolvable:$true] %s408_s7 }
 0x3ff   :  { %s566_s8 = scalar_lea.vmem %s409_s7, 32  ;;  %p571_p11 = scmp.lt.s32.totalorder %s409_s7, %s409_s7 }
 0x400   :  { %p567_p10 = scmp.ne.s32.totalorder %s409_s7, %s566_s8  ;;  %p572_p12 = scmp.lt.s32.totalorder %s566_s8, %s566_s8 }
 0x402   :  { %p573_p13 = por %p572_p12, %p571_p11 }
 0x404   :  { %p574_p0 = pnand %p573_p13, %p567_p10 }
 0x4c2   :  { %v319_v59 = vpop.f32.mrb[0].mxu1 }
 0x4c3   :  { %v463_v60 = vpop.f32.mrb[1].mxu1 }
 0x4c6   :  { %v391_v61 = vpop.f32.mrb[2].mxu1 }
 0x4c7   :  { %v397_v62 = vrot.slane %v391_v61, 7  ;;  %v468_v63 = vpop.f32.mrb[3].mxu1 }
 0x4c9   :  { %v398_v0 = vsel %vm171_vm1, %v397_v62, %v319_v59 }
 0x4ca   :  { %401 = vst.msk [vmem:[#allocation7] sm:$0x3] %vm400_vm5, %v398_v0 }
 0x4cb   :  { %577 = shalt.err (!%p574_p0)
}
 0x4cc   :  { %s578_s10 = scalar_lea.hbm %s704_s4, 32 }
 0x4cd   :  { %p579_p1 = scmp.ne.s32.totalorder %s704_s4, %s578_s10  ;;  %p582_p2 = scmp.lt.u32.totalorder %s578_s10, %s704_s4 }
 0x4cf   :  { %p584_p3 = pnand %p582_p2, %p579_p1 }
 0x4d1   :  { %587 = shalt.err (!%p584_p3)
}
 0x4d2   :  { %411 = dma.vmem_to_hbm [thread:$0]  %s409_s7, 32, %s704_s4, [#allocation4]  }
 0x4d3   :  { %592 = dma.done.wait [#allocation4], 32  }
 0x4d4   :  { %593 = vsyncadd [#allocation4], 4294967264 }
 0x4d5   :  { %594 = dma.done.wait [#allocation9], 32  }
 0x4d6   :  { %595 = vsyncadd [#allocation9], 4294967264 }
 0x4d7   :  { %428 = vsyncpa [#allocation3], 1 }
 0x4d8   :  { %429 = vsyncpa [#allocation6], 1 }
 0x4d9   :  { %430 = vsyncpa [#allocation4], 1 }
 0x4da   :  { %431 = vsyncpa [#allocation9], 1 }

// kernel: tpu_custom_call.1
= control target key start
LH: loop header
LB: loop body
LE: loop exit
PB: predicated region body
PF: predicated region fallthrough
CT: control target
= control target key end

     0   :  { %11 = vsyncpa [#allocation3], 0  ;;  %s560_s0 = inlined_call_operand.hbm [shape: f32[2,8,32], index: 0, kind: input, shape index: {}]   ;;  %s561_s1 = inlined_call_operand.hbm [shape: f32[32,128], index: 1, kind: input, shape index: {}]   ;;  %s562_s2 = inlined_call_operand.vmem [shape: f32[1,128], index: 2, kind: input, shape index: {}]   ;;  %s563_s3 = inlined_call_operand.vmem [shape: f32[1,128], index: 3, kind: input, shape index: {}]   ;;  %s564_s4 = inlined_call_operand.hbm [shape: f32[2,32], index: 4, kind: output, shape index: {0}]   ;;  %s565_s5 = inlined_call_operand.hbm [shape: f32[2,8], index: 5, kind: output, shape index: {1}]  }
   0x1   :  { %12 = vsyncpa [#allocation6], 0 }
   0x2   :  { %13 = vsyncpa [#allocation4], 0 }
   0x3   :  { %14 = vsyncpa [#allocation9], 0  ;;  %s450_s18 = smov [#allocation2]   ;;  %s354_s22 = scalar_lea.hbm %s560_s0, 256 }
   0x4   :  { %s20_s19 = sshll.u32 %s450_s18, 4  ;;  %p355_p0 = scmp.ne.s32.totalorder %s560_s0, %s354_s22  ;;  %s21_s19 = int_to_ptr.vmem [resolvable:$true] %s20_s19 }
   0x5   :  { %p358_p1 = scmp.lt.u32.totalorder %s354_s22, %s560_s0 }
   0x7   :  { %p360_p2 = pnand %p358_p1, %p355_p0 }
   0x9   :  { %363 = shalt.err (!%p360_p2)
}
   0xa   :  { %s364_s27 = scalar_lea.vmem %s21_s19, 256  ;;  %p369_p4 = scmp.lt.s32.totalorder %s21_s19, %s21_s19 }
   0xb   :  { %p365_p3 = scmp.ne.s32.totalorder %s21_s19, %s364_s27  ;;  %p370_p5 = scmp.lt.s32.totalorder %s364_s27, %s364_s27 }
   0xd   :  { %p371_p6 = por %p370_p5, %p369_p4 }
   0xf   :  { %p372_p7 = pnand %p371_p6, %p365_p3 }
  0x11   :  { %375 = shalt.err (!%p372_p7)
}
  0x12   :  { %s451_s28 = smov 128   ;;  %s452_s29 = smov 8  }
  0x13   :  { %26 = dma.hbm_to_vmem [thread:$0]  %s560_s0, 256, %s21_s19, [#allocation3], %s451_s28, %s451_s28, %s452_s29  }
  0x14   :  { %s453_s7 = smov [#allocation5]   ;;  %s376_s11 = scalar_lea.hbm %s561_s1, 512 }
  0x15   :  { %s32_s8 = sshll.u32 %s453_s7, 4  ;;  %p377_p8 = scmp.ne.s32.totalorder %s561_s1, %s376_s11  ;;  %s33_s8 = int_to_ptr.vmem [resolvable:$true] %s32_s8 }
  0x16   :  { %p380_p9 = scmp.lt.u32.totalorder %s376_s11, %s561_s1 }
  0x18   :  { %p382_p10 = pnand %p380_p9, %p377_p8 }
  0x1a   :  { %385 = shalt.err (!%p382_p10)
}
  0x1b   :  { %s386_s16 = scalar_lea.vmem %s33_s8, 512  ;;  %p391_p12 = scmp.lt.s32.totalorder %s33_s8, %s33_s8 }
  0x1c   :  { %p387_p11 = scmp.ne.s32.totalorder %s33_s8, %s386_s16  ;;  %p392_p13 = scmp.lt.s32.totalorder %s386_s16, %s386_s16 }
  0x1e   :  { %p393_p0 = por %p392_p13, %p391_p12 }
  0x20   :  { %p394_p1 = pnand %p393_p0, %p387_p11 }
  0x22   :  { %397 = shalt.err (!%p394_p1)
}
  0x23   :  { %38 = dma.hbm_to_vmem [thread:$0]  %s561_s1, 512, %s33_s8, [#allocation6], %s451_s28, %s451_s28, %s452_s29  }
  0x24   :  { %442 = dma.done.wait [#allocation3], 256  }
  0x25   :  { %443 = vsyncadd [#allocation3], 4294967040 }
  0x26   :  { %444 = dma.done.wait [#allocation6], 512  }
  0x27   :  { %445 = vsyncadd [#allocation6], 4294966784  ;;  %vm62_vm0 = vcmask 261120   ;;  %v51_v0 = vld [vmem:[#allocation5] sm:$0xff]  ;;  %v52_v1 = vld [vmem:[#allocation5 + $0x8] sm:$0xff]  ;;  %v161_v18 = vlaneseq  ;;  %vm171_vm1 = vcmask 1041409  }
  0x28   :  { %v53_v2 = vld [vmem:[#allocation5 + $0x10] sm:$0xff]  ;;  %v325_v3 = vpack.c.bf16 %v52_v1, %v51_v0  ;;  %v54_v4 = vld [vmem:[#allocation5 + $0x18] sm:$0xff]  ;;  %vm174_vm2 = vcmask 58368   ;;  %v454_v28 = vmov 0  }
  0x29   :  { %v511_v5 = vld [vmem:[#allocation2] sm:$0xff]  ;;  %v329_v6 = vpack.c.bf16 %v54_v4, %v53_v2  ;;  %v515_v7 = vld [vmem:[#allocation2 + $0x8] sm:$0xff]  ;;  %v162_v19 = vand.u32 127, %v161_v18  ;;  %v164_v20 = vshrl.u32 %v161_v18, 7  ;;  %341 = vset.pattern.permute.xlu0 %v454_v28  ;;  %340 = vset.pattern.permute.xlu1 %v454_v28 }
  0x2a   :  { %322 = vmatprep.mubr.msk.f32.mxu0 %vm62_vm0, %v511_v5  ;;  %326 = vmatprep.subr.bf16.mxu0 %v325_v3  ;;  %v304_v8 = vld [vmem:[%s562_s2] ss:$0 sm:$0xff]  ;;  %s455_s2 = smov [#allocation8]  }
  0x2b   :  { %328 = vmatpush3.bf16.msra.mxu0 %v325_v3  ;;  %v307_v13 = vld [vmem:[%s563_s3] ss:$0 sm:$0xff]  ;;  %v165_v22 = vsub.s32 %v162_v19, %v164_v20  ;;  %v181_v29 = vsub.s32 0, %v164_v20  ;;  %v185_v30 = vsub.s32 1, %v164_v20  ;;  %s290_s3 = sshll.u32 %s455_s2, 4  ;;  %s291_s3 = int_to_ptr.vmem [resolvable:$true] %s290_s3 }
  0x2c   :  { %330 = vmatprep.subr.bf16.mxu0 %v329_v6  ;;  %s398_s21 = scalar_lea.vmem %s291_s3, 32  ;;  %p403_p3 = scmp.lt.s32.totalorder %s291_s3, %s291_s3 }
  0x2d   :  { %p399_p2 = scmp.ne.s32.totalorder %s291_s3, %s398_s21  ;;  %p404_p4 = scmp.lt.s32.totalorder %s398_s21, %s398_s21 }
  0x2f   :  { %332 = vmatpush3.bf16.msra.mxu0 %v329_v6  ;;  %p405_p5 = por %p404_p4, %p403_p3 }
  0x31   :  { %p406_p6 = pnand %p405_p5, %p399_p2 }
  0x32   :  { %323 = vmatmul.mubr.msk.f32.vlgmr.msra.gmra.mrb[0].mxu0 %vm62_vm0, %v515_v7 }
 0x105   :  { %v324_v9 = vpop.f32.mrb[0].mxu0 }
 0x106   :  { %v135_v10 = vpop.f32.mrb[1].mxu0  ;;  %v141_v11 = vadd.f32 %v324_v9, %v304_v8 }
 0x107   :  { %v136_v12 = vadd.f32 %v304_v8, %v135_v10 }
 0x109   :  { %342 = vtanh.f32 %v136_v12 }
 0x10a   :  { %344 = vtanh.f32 %v141_v11 }
 0x113   :  { %v343_v14 = vpop.eup %342 }
 0x114   :  { %v153_v15 = vmul.f32 %v343_v14, %v307_v13  ;;  %v345_v16 = vpop.eup %344 }
 0x115   :  { %v154_v17 = vmul.f32 %v345_v16, %v307_v13 }
 0x116   :  { %155 = vadd.xlane.f32.xlu0 %v153_v15 }
 0x11a   :  { %157 = vadd.xlane.f32.xlu0 %v154_v17 }
 0x1a3   :  { %v156_v21 = vpop.xlane.xlu0 %155 }
 0x1a4   :  { %v166_v24 = vrot.slane %v156_v21, %v165_v22 }
 0x1a7   :  { %v158_v23 = vpop.xlane.xlu0 %157 }
 0x1a8   :  { %v170_v25 = vrot.slane %v158_v23, %v165_v22 }
 0x1aa   :  { %v172_v26 = vsel %vm171_vm1, %v170_v25, %v166_v24 }
 0x1ab   :  { %v175_v27 = vsel %vm174_vm2, %v172_v26, -inf }
 0x1ac   :  { %176 = vmax.xlane.f32.xlu1 %v175_v27 }
 0x239   :  { %v177_v31 = vpop.xlane.xlu1 %176 }
 0x23a   :  { %v182_v32 = vrot.slane %v177_v31, %v181_v29  ;;  %v186_v33 = vrot.slane %v177_v31, %v185_v30 }
 0x23c   :  { %v189_v34 = vsub.f32 %v156_v21, %v182_v32  ;;  %v190_v35 = vsub.f32 %v158_v23, %v186_v33 }
 0x23e   :  { %v191_v36 = vmul.f32 1.442695, %v189_v34  ;;  %v193_v37 = vmul.f32 1.442695, %v190_v35 }
 0x240   :  { %346 = vpow2.f32 %v191_v36 }
 0x241   :  { %348 = vpow2.f32 %v193_v37 }
 0x24a   :  { %v347_v38 = vpop.eup %346 }
 0x24b   :  { %v349_v39 = vpop.eup %348  ;;  %198 = vperm.xlu1 %340, %v347_v38  }
 0x24c   :  { %201 = vperm.xlu0 %341, %v349_v39  }
 0x2ca   :  { %v199_v40 = vpop.permute.xlu1 %198 }
 0x2cb   :  { %v202_v41 = vpop.permute.xlu0 %201  ;;  %v206_v42 = vrot.slane %v199_v40, %v165_v22 }
 0x2cc   :  { %v210_v43 = vrot.slane %v202_v41, %v165_v22 }
 0x2ce   :  { %v211_v44 = vsel %vm171_vm1, %v210_v43, %v206_v42 }
 0x2cf   :  { %v213_v45 = vsel %vm174_vm2, %v211_v44, 0.0 }
 0x2d0   :  { %214 = vadd.xlane.f32.xlu1 %v213_v45 }
 0x35d   :  { %v215_v46 = vpop.xlane.xlu1 %214 }
 0x35e   :  { %v220_v47 = vrot.slane %v215_v46, %v181_v29  ;;  %v224_v48 = vrot.slane %v215_v46, %v185_v30 }
 0x360   :  { %350 = vrcp.f32 %v220_v47 }
 0x361   :  { %352 = vrcp.f32 %v224_v48 }
 0x36a   :  { %v351_v49 = vpop.eup %350 }
 0x36b   :  { %v228_v50 = vmul.f32 %v351_v49, %v347_v38  ;;  %v353_v51 = vpop.eup %352 }
 0x36c   :  { %v230_v52 = vmul.f32 %v353_v51, %v349_v39 }
 0x36d   :  { %234 = vperm.xlu0 %341, %v228_v50  }
 0x371   :  { %237 = vperm.xlu0 %341, %v230_v52  }
 0x3ec   :  { %v235_v53 = vpop.permute.xlu0 %234 }
 0x3ed   :  { %v252_v54 = vmul.f32 %v235_v53, %v511_v5  ;;  %v242_v58 = vrot.slane %v235_v53, %v165_v22 }
 0x3ef   :  { %v254_v55 = vsel %vm62_vm0, %v252_v54, 0.0 }
 0x3f0   :  { %v255_v56 = vrot.slane %v254_v55, 4  ;;  %v238_v57 = vpop.permute.xlu0 %237 }
 0x3f1   :  { %v246_v59 = vrot.slane %v238_v57, %v165_v22  ;;  %v253_v60 = vmul.f32 %v238_v57, %v515_v7 }
 0x3f2   :  { %v256_v61 = vadd.f32 %v255_v56, %v254_v55 }
 0x3f3   :  { %v261_v62 = vsel %vm62_vm0, %v253_v60, 0.0  ;;  %v247_v63 = vsel %vm171_vm1, %v246_v59, %v242_v58 }
 0x3f4   :  { %v257_v0 = vrot.slane %v256_v61, 2  ;;  %v262_v1 = vrot.slane %v261_v62, 4  ;;  %249 = vst.msk [vmem:[#allocation8] sm:$0x3] %vm174_vm2, %v247_v63 }
 0x3f5   :  { %409 = shalt.err (!%p406_p6)
}
 0x3f6   :  { %s410_s24 = scalar_lea.hbm %s565_s5, 32 }
 0x3f7   :  { %p411_p7 = scmp.ne.s32.totalorder %s565_s5, %s410_s24  ;;  %p414_p8 = scmp.lt.u32.totalorder %s410_s24, %s565_s5 }
 0x3f9   :  { %p416_p9 = pnand %p414_p8, %p411_p7 }
 0x3fb   :  { %419 = shalt.err (!%p416_p9)
}
 0x3fc   :  { %293 = dma.vmem_to_hbm [thread:$0]  %s291_s3, 32, %s565_s5, [#allocation9]   ;;  %v258_v2 = vadd.f32 %v257_v0, %v256_v61  ;;  %v263_v3 = vadd.f32 %v262_v1, %v261_v62  ;;  %vm272_vm3 = vcmask 254976  }
 0x3fd   :  { %s456_s6 = smov [#allocation7]  }
 0x3fe   :  { %v264_v4 = vrot.slane %v263_v3, 2  ;;  %v259_v5 = vrot.slane %v258_v2, 1  ;;  %s280_s7 = sshll.u32 %s456_s6, 4  ;;  %s281_s7 = int_to_ptr.vmem [resolvable:$true] %s280_s7 }
 0x3ff   :  { %s420_s8 = scalar_lea.vmem %s281_s7, 32  ;;  %p425_p11 = scmp.lt.s32.totalorder %s281_s7, %s281_s7 }
 0x400   :  { %v265_v6 = vadd.f32 %v264_v4, %v263_v3  ;;  %v260_v9 = vadd.f32 %v259_v5, %v258_v2  ;;  %p421_p10 = scmp.ne.s32.totalorder %s281_s7, %s420_s8  ;;  %p426_p12 = scmp.lt.s32.totalorder %s420_s8, %s420_s8 }
 0x402   :  { %v266_v7 = vrot.slane %v265_v6, 1  ;;  %p427_p13 = por %p426_p12, %p425_p11 }
 0x404   :  { %v267_v8 = vadd.f32 %v266_v7, %v265_v6  ;;  %p428_p0 = pnand %p427_p13, %p421_p10 }
 0x406   :  { %v270_v10 = vsel %vm171_vm1, %v267_v8, %v260_v9 }
 0x407   :  { %273 = vst.msk [vmem:[#allocation7] sm:$0x3] %vm272_vm3, %v270_v10 }
 0x408   :  { %431 = shalt.err (!%p428_p0)
}
 0x409   :  { %s432_s10 = scalar_lea.hbm %s564_s4, 32 }
 0x40a   :  { %p433_p1 = scmp.ne.s32.totalorder %s564_s4, %s432_s10  ;;  %p436_p2 = scmp.lt.u32.totalorder %s432_s10, %s564_s4 }
 0x40c   :  { %p438_p3 = pnand %p436_p2, %p433_p1 }
 0x40e   :  { %441 = shalt.err (!%p438_p3)
}
 0x40f   :  { %283 = dma.vmem_to_hbm [thread:$0]  %s281_s7, 32, %s564_s4, [#allocation4]  }
 0x410   :  { %446 = dma.done.wait [#allocation4], 32  }
 0x411   :  { %447 = vsyncadd [#allocation4], 4294967264 }
 0x412   :  { %448 = dma.done.wait [#allocation9], 32  }
 0x413   :  { %449 = vsyncadd [#allocation9], 4294967264 }
 0x414   :  { %300 = vsyncpa [#allocation3], 1 }
 0x415   :  { %301 = vsyncpa [#allocation6], 1 }
 0x416   :  { %302 = vsyncpa [#allocation4], 1 }
 0x417   :  { %303 = vsyncpa [#allocation9], 1 }

</bundles_post_ra>
